<compile_context>
chip_gen: v5e
topology: v5e:2x2
jax: 0.10.0
libtpu: 0.0.40
codegen_flags: <defaults>
</compile_context>

<pallas_src>
import functools
import math

import jax
import jax.numpy as jnp
from jax.experimental import pallas as pl
from jax.experimental.pallas import tpu as pltpu


def _round_up(x: int, m: int) -> int:
    return (x + m - 1) // m * m


# ---------------------------------------------------------------------------
# Kernels
# ---------------------------------------------------------------------------

def _gather_vmem_kernel(ids_ref, table_ref, out_ref, *,
                        scale, tokens_per_tile, ids_blocked):
    """Small-table path: table is VMEM-resident; gather rows with dynamic slices."""
    vocab = table_ref.shape[0]
    base = 0 if ids_blocked else pl.program_id(0) * tokens_per_tile

    @pl.loop(0, tokens_per_tile)
    def _row(t):
        # TODO(synk): PyTorch nn.Embedding raises on out-of-range ids; here they clamp.
        tok = jnp.clip(ids_ref[base + t], 0, vocab - 1)
        row = table_ref[pl.ds(tok, 1), :]
        out_ref[pl.ds(t, 1), :] = (row * scale).astype(out_ref.dtype)


def _gather_hbm_kernel(ids_ref, table_hbm, out_ref, sems, *,
                       scale, tokens_per_tile, window, ids_blocked):
    """Large-table path: per-row HBM->VMEM DMAs landing directly in the output tile."""
    vocab = table_hbm.shape[0]
    inflight = min(window, tokens_per_tile)
    base = 0 if ids_blocked else pl.program_id(0) * tokens_per_tile

    def clamped_id(t):
        # TODO(synk): PyTorch nn.Embedding raises on out-of-range ids; here they clamp
        # so a bad id can never trigger an out-of-bounds HBM DMA.
        return jnp.clip(ids_ref[base + t], 0, vocab - 1)

    def row_copy(t, tok):
        # Every copy moves exactly one (1, D) row, so the per-slot counting semaphores
        # stay balanced even when two same-sized copies overlap on one slot.
        return pltpu.make_async_copy(
            table_hbm.at[pl.ds(tok, 1), :],     # (1, D) row in HBM
            out_ref.at[pl.ds(t, 1), :],         # lands straight in the output tile
            sems.at[t % inflight],
        )

    # Prime the DMA window (raise `dma_window` toward 128 on v7x; ~32 suffices on v5e).
    @pl.loop(0, inflight)
    def _prime(t):
        row_copy(t, clamped_id(t)).start()

    # Steady state: issue the refill *before* waiting on the current slot so the DMA
    # queue never dips below `inflight`, and the scalar SMEM id read for the refill is
    # not serialized behind the wait.
    @pl.loop(0, tokens_per_tile)
    def _drain(t):
        nxt = t + inflight

        @pl.when(nxt < tokens_per_tile)
        def _refill():
            row_copy(nxt, clamped_id(nxt)).start()

        row_copy(t, clamped_id(t)).wait()

    # All rows have landed; fused sqrt(d_model) scaling as one lane-dense pass.
    # TODO(synk): cross-step double-buffering of the landing region would hide this
    # per-tile drain tail behind the next tile's gather.
    out_ref[...] = (out_ref[...] * scale).astype(out_ref.dtype)


# ---------------------------------------------------------------------------
# Wrapper
# ---------------------------------------------------------------------------

def embeddings_forward(x, table, *, token_tile=256, dma_window=64,
                       vmem_table_budget_bytes=8 * 1024 * 1024,
                       force_hbm_gather=False):
    """Pallas forward of `Embeddings`: returns table[x] * sqrt(d_model).

    x     : (B, S) integer token ids
    table : (V, D) embedding matrix (any float dtype; a bf16 table halves both gather
            and writeback bytes on this memory-bound kernel)
    """
    B, S = x.shape
    V, D = table.shape
    N = B * S
    itemsize = table.dtype.itemsize
    scale = float(math.sqrt(D))

    ids = x.reshape(N).astype(jnp.int32)

    # Token tile: multiple of 8 (sublane granularity), no larger than the token count.
    token_tile = _round_up(max(8, min(int(token_tile), _round_up(N, 8))), 8)

    # Pad the flattened token axis to a multiple of the tile.  Pad rows gather token 0
    # and are sliced off afterwards; prefer a token_tile dividing B*S so the slice (an
    # extra HBM copy) is skipped entirely.
    pad = (-N) % token_tile
    if pad:
        ids = jnp.concatenate([ids, jnp.zeros((pad,), jnp.int32)])
    n_padded = N + pad
    grid = (n_padded // token_tile,)

    use_vmem_table = (not force_hbm_gather) and (V * D * itemsize <= vmem_table_budget_bytes)

    out_spec = pl.BlockSpec((token_tile, D), lambda i: (i, 0))

    if use_vmem_table:
        # Small-table fast path: table resident in VMEM across the whole grid.
        table_spec = pl.BlockSpec((V, D), lambda i: (0, 0))
        scratch_shapes = ()
        table_vmem_bytes = V * D * itemsize
        kernel_fn, extra = _gather_vmem_kernel, {}
    else:
        # Large-table path: table stays in HBM, per-row DMA gather.
        window = max(1, min(int(dma_window), token_tile))
        table_spec = pl.BlockSpec(memory_space=pl.ANY)
        scratch_shapes = (pltpu.SemaphoreType.DMA((window,)),)   # per-slot DMA sems
        table_vmem_bytes = 0
        kernel_fn, extra = _gather_hbm_kernel, {"window": window}

    # VMEM budget: double-buffered output tile (+ resident table on the fast path).
    needed = 2 * token_tile * D * itemsize + table_vmem_bytes
    vmem_limit = int(min(64 * 1024 * 1024, max(32 * 1024 * 1024, 1.5 * needed)))

    def build(ids_blocked):
        if ids_blocked:
            # Per-tile SMEM ids: caps SMEM use at token_tile * 4 B regardless of B*S.
            ids_spec = pl.BlockSpec((token_tile,), lambda i: (i,),
                                    memory_space=pltpu.MemorySpace.SMEM)
        else:
            # Compatibility fallback: whole flattened id array resident in SMEM.
            ids_spec = pl.BlockSpec(memory_space=pltpu.MemorySpace.SMEM)
        kernel = functools.partial(kernel_fn, scale=scale, tokens_per_tile=token_tile,
                                   ids_blocked=ids_blocked, **extra)
        return pl.pallas_call(
            kernel,
            out_shape=jax.ShapeDtypeStruct((n_padded, D), table.dtype),
            grid=grid,
            in_specs=[ids_spec, table_spec],
            out_specs=out_spec,
            scratch_shapes=scratch_shapes,
            compiler_params=pltpu.CompilerParams(
                # Independent token tiles; shardable across TensorCores on multi-TC
                # parts.  TODO(synk): consider pltpu.CORE_PARALLEL if plain "parallel"
                # does not shard this axis across v7x's two TensorCores.
                dimension_semantics=("parallel",),
                vmem_limit_bytes=vmem_limit,
            ),
        )

    try:
        out = build(ids_blocked=True)(ids, table)
    except Exception:
        # Fallback for JAX versions without blocked SMEM operand support.
        out = build(ids_blocked=False)(ids, table)

    if pad:
        out = out[:N]
    return out.reshape(B, S, D)


# ---------------------------------------------------------------------------
# Demo / self-test
# ---------------------------------------------------------------------------

if __name__ == "__main__":
    n_token = 64     # vocabulary size
    d_model = 32     # embedding width (production widths should be multiples of 128)
    B, S = 2, 8      # batch, sequence length

    key = jax.random.PRNGKey(0)
    k_tab, k_ids = jax.random.split(key)

    # nn.Embedding default init: weight ~ N(0, 1)
    table = jax.random.normal(k_tab, (n_token, d_model), dtype=jnp.float32)
    x = jax.random.randint(k_ids, (B, S), 0, n_token, dtype=jnp.int32)

    ref = table[x] * math.sqrt(d_model)

    # 1) Small-table fast path (VMEM-resident table, in-kernel row gather).
    out_fast = jax.block_until_ready(embeddings_forward(x, table))
    assert out_fast.shape == (B, S, d_model), out_fast.shape
    assert jnp.allclose(out_fast, ref, atol=1e-5, rtol=1e-5), "VMEM-table path mismatch"

    # 2) Large-table path, forced: HBM-resident table with per-row DMA gather straight
    #    into the output tile (small tile/window to exercise prime -> refill -> drain).
    out_dma = jax.block_until_ready(
        embeddings_forward(x, table, force_hbm_gather=True, token_tile=8, dma_window=4))
    assert out_dma.shape == (B, S, d_model), out_dma.shape
    assert jnp.allclose(out_dma, ref, atol=1e-5, rtol=1e-5), "HBM-gather path mismatch"

    print("KERNEL_OK")
</pallas_src>

<mosaic_0001>
module attributes {stable_mosaic.version = 11 : i64} {
  func.func @_gather_vmem_kernel(%arg0: i32, %arg1: memref<16xi32, #tpu.memory_space<smem>>, %arg2: memref<64x32xf32, #tpu.memory_space<vmem>>, %arg3: memref<16x32xf32, #tpu.memory_space<vmem>>) attributes {dimension_semantics = [#tpu.dimension_semantics<parallel>], iteration_bounds = array<i64: 1>, scalar_prefetch = 0 : i64, scratch_operands = 0 : i64, tpu.core_type = #tpu.core_type<tc>, window_params = [{transform_indices = @transform_0, window_bounds = array<i64: 16>}, {pipeline_mode = #tpu.pipeline_mode<synchronous>, transform_indices = @transform_1, window_bounds = array<i64: 64, 32>}, {transform_indices = @transform_2, window_bounds = array<i64: 16, 32>}]} {
    %c16_i32 = arith.constant 16 : i32
    %0 = arith.muli %arg0, %c16_i32 : i32
    %c0_i32 = arith.constant 0 : i32
    %c16_i32_0 = arith.constant 16 : i32
    %1 = arith.addi %c0_i32, %c16_i32_0 : i32
    %c1_i32 = arith.constant 1 : i32
    scf.for %arg4 = %c0_i32 to %1 step %c1_i32  : i32 {
      %c1_i32_2 = arith.constant 1 : i32
      %2 = arith.muli %arg4, %c1_i32_2 : i32
      %c0_i32_3 = arith.constant 0 : i32
      %3 = arith.addi %c0_i32_3, %2 : i32
      %4 = arith.addi %0, %3 : i32
      %5 = arith.index_cast %4 : i32 to index
      %6 = memref.load %arg1[%5] : memref<16xi32, #tpu.memory_space<smem>>
      %c0_i32_4 = arith.constant 0 : i32
      %c63_i32 = arith.constant 63 : i32
      %7 = arith.maxsi %c0_i32_4, %6 : i32
      %8 = arith.minsi %c63_i32, %7 : i32
      %9 = arith.index_cast %8 : i32 to index
      %c0 = arith.constant 0 : index
      %10 = vector.load %arg2[%9, %c0] : memref<64x32xf32, #tpu.memory_space<vmem>>, vector<1x32xf32>
      %cst = arith.constant 5.65685415 : f32
      %11 = vector.broadcast %cst : f32 to vector<1x32xf32>
      %12 = arith.mulf %10, %11 : vector<1x32xf32>
      %13 = arith.index_cast %3 : i32 to index
      %c0_5 = arith.constant 0 : index
      %14 = vector.load %arg3[%13, %c0_5] : memref<16x32xf32, #tpu.memory_space<vmem>>, vector<1x32xf32>
      tpu.vector_store %arg3[%13, %c0_5], %12 {strides = array<i32>} : memref<16x32xf32, #tpu.memory_space<vmem>>, vector<1x32xf32>,
    }
    %c16_i32_1 = arith.constant 16 : i32
    return
  }
  func.func @transform_0(%arg0: i32) -> i32 {
    %c0_i32 = arith.constant 0 : i32
    %c0_i32_0 = arith.constant 0 : i32
    return %c0_i32 : i32
  }
  func.func @transform_1(%arg0: i32) -> (i32, i32) {
    %c0_i32 = arith.constant 0 : i32
    %c0_i32_0 = arith.constant 0 : i32
    %c0_i32_1 = arith.constant 0 : i32
    return %c0_i32, %c0_i32_0 : i32, i32
  }
  func.func @transform_2(%arg0: i32) -> (i32, i32) {
    %c0_i32 = arith.constant 0 : i32
    %c0_i32_0 = arith.constant 0 : i32
    return %arg0, %c0_i32 : i32, i32
  }
}

</mosaic_0001>

<bundles_post_ra>
// kernel: tpu_custom_call.1
= control target key start
LH: loop header
LB: loop body
LE: loop exit
PB: predicated region body
PF: predicated region fallthrough
CT: control target
= control target key end

     0   :  { %7 = vsyncpa [#allocation4], 0  ;;  %s165_s0 = inlined_call_operand.vmem [shape: s32[16], index: 0, kind: input, shape index: {}]   ;;  %s166_s1 = inlined_call_operand.vmem [shape: f32[64,32], index: 1, kind: input, shape index: {}]   ;;  %s167_s2 = inlined_call_operand.hbm [shape: f32[16,32], index: 2, kind: output, shape index: {}]  }
   0x1   :  { %8 = vsyncpa [#allocation3], 0  ;;  %s14_s11 = sshll.u32 %s165_s0, 4  ;;  %s137_s12 = smov [#allocation2]   ;;  %s15_s11 = int_to_ptr.vmem [resolvable:$true] %s14_s11 }
   0x2   :  { %17 = dma.vmem_to_smem %s15_s11, 16, %s137_s12, [#allocation4]  }
   0x3   :  { %129 = dma.done.wait [#allocation4], 16  }
   0x4   :  { %130 = vsyncadd [#allocation4], 4294967280 }
   0x5   :  { %24 = sfence }
   0x6   :  { %s133_s13 = smov 0  }
   0x7 LB: > { %s33_s14 = sld [smem:[#allocation2 + %s135_s13]]  ;;  %vm42_vm0 = vcmask 253952   ;;  %s41_s0 = scalar_lea.vmem [#allocation5], %s135_s13  ;;  %s135_s13 = sphi %s133_s13, %s31_s13  }
   0x8   : > { %s31_s13 = sadd.s32 1, %s135_s13  }
   0x9   : > { %p28_p2 = scmp.ge.s32.totalorder %s31_s13, 16  }
   0xa   :  { %s50_s20 = sshll.u32 (%p28_p2), %s167_s2, 4  ;;  %s138_s21 = smov (%p28_p2), [#allocation5]   ;;  %s51_s20 = int_to_ptr.hbm [resolvable:$true] %s50_s20 }
   0xb   :  { %s48_s22 = sshll.u32 (%p28_p2), %s138_s21, 4  ;;  %s139_s23 = smov (%p28_p2), 128   ;;  %s49_s22 = int_to_ptr.vmem [resolvable:$true] %s48_s22 }
   0xc   :  { %s140_s24 = smov (%p28_p2), 8  }
   0xd   : > { %p34_p0 = scmp.gt.s32.totalorder %s33_s14, 0  ;;  %p70_p1 = scmp.lt.s32.totalorder %s33_s14, 63 }
   0xf   : > { %s169_s14 = smov (!%p34_p0, %s33_s14), 0 }
  0x10   : > { %s171_s14 = smov (!%p70_p1, %s169_s14), 63 }
  0x11   : > { %s38_s17 = scalar_lea.vmem %s166_s1, %s171_s14  ;;  %30 = sbr.rel (!%p28_p2) target bundleno = 7 (0x7), region = 41 }
  0x12   : > { %v39_v0 = vld [vmem:[%s38_s17] sm:$0x1] }
  0x13   : > { %v40_v1 = vmul.f32 5.656854, %v39_v0 }
  0x15   : > { %43 = vst.msk [vmem:[%s41_s0] sm:$0x1] %vm42_vm0, %v40_v1 }
  0x16   :  { %56 = dma.vmem_to_hbm [thread:$0]  %s49_s22, 256, %s51_s20, [#allocation3], %s139_s23, %s139_s23, %s140_s24  }
  0x17   :  { %131 = dma.done.wait [#allocation3], 256  }
  0x18   :  { %132 = vsyncadd [#allocation3], 4294967040 }
  0x19   :  { %61 = vsyncpa [#allocation3], 1 }
  0x1a   :  { %62 = vsyncpa [#allocation4], 1 }

</bundles_post_ra>
